<compile_context>
chip_gen: v7x
topology: tpu7x:2x2x1
jax: 0.10.0
libtpu: 0.0.40
codegen_flags: <defaults>
</compile_context>

<pallas_src>
import functools

import jax
import jax.numpy as jnp
from jax.experimental import pallas as pl
from jax.experimental.pallas import tpu as pltpu

_LANE = 128      # lane width: last-dim padding target
_SUBLANE = 8     # sublane width: batch padding target
_NEG_SLOPE = 0.01  # PyTorch leaky_relu default


def _round_up(n, m):
    return ((n + m - 1) // m) * m


def _make_fused_mlp_kernel(num_layers):
    """Kernel body: refs = (x_ref, w0, b0, w1, b1, ..., o_ref)."""

    def kernel(*refs):
        x_ref = refs[0]
        o_ref = refs[-1]
        h = x_ref[...]                                    # (Bp, Din_p) f32
        for i in range(num_layers):
            w = refs[1 + 2 * i][...]                      # (Din_p, Dout_p)
            b = refs[2 + 2 * i][...]                      # (1, Dout_p)
            y = jnp.dot(h, w, preferred_element_type=jnp.float32)
            y = y + b                                     # broadcast over batch
            h = jnp.maximum(y, _NEG_SLOPE * y)            # leaky_relu
        o_ref[...] = h.astype(o_ref.dtype)

    return kernel


def _fused_mlp(x_pad, padded_params):
    """Run the whole (padded) MLP in one pallas_call. Returns padded output."""
    Bp, _ = x_pad.shape
    num_layers = len(padded_params)
    dout_pad = padded_params[-1][0].shape[1]
    itemsize = jnp.dtype(x_pad.dtype).itemsize

    inputs = [x_pad]
    vmem = pl.BlockSpec(memory_space=pltpu.MemorySpace.VMEM)
    in_specs = [vmem]
    for w, b in padded_params:
        inputs.extend((w, b))
        in_specs.extend((vmem, vmem))

    flops = 2 * Bp * sum(int(w.shape[0]) * int(w.shape[1])
                         for w, _ in padded_params)
    bytes_accessed = sum(int(a.size) * a.dtype.itemsize for a in inputs)
    bytes_accessed += Bp * dout_pad * itemsize

    return pl.pallas_call(
        _make_fused_mlp_kernel(num_layers),
        out_shape=jax.ShapeDtypeStruct((Bp, dout_pad), x_pad.dtype),
        in_specs=in_specs,
        out_specs=pl.BlockSpec(memory_space=pltpu.MemorySpace.VMEM),
        cost_estimate=pl.CostEstimate(
            flops=flops, transcendentals=0, bytes_accessed=bytes_accessed),
    )(*inputs)


class HiddedLayersPallas:
    """JAX/Pallas port of the PyTorch HiddedLayers module (MLP + leaky_relu)."""

    def __init__(self, shape, key):
        self.shape = tuple(shape)
        self.params = []         # unpadded (W, b), for reference checking
        self.padded_params = []  # lane-padded (W, b) fed to the fused kernel
        for i in range(len(shape) - 1):
            fan_in, fan_out = shape[i], shape[i + 1]
            key, kw, kb = jax.random.split(key, 3)
            # PyTorch Linear default init: U(-1/sqrt(fan_in), 1/sqrt(fan_in))
            bound = 1.0 / (fan_in ** 0.5)
            w = jax.random.uniform(
                kw, (fan_in, fan_out), jnp.float32, minval=-bound, maxval=bound)
            b = jax.random.uniform(
                kb, (fan_out,), jnp.float32, minval=-bound, maxval=bound)
            self.params.append((w, b))

            fi_p = _round_up(fan_in, _LANE)
            fo_p = _round_up(fan_out, _LANE)
            w_p = jnp.zeros((fi_p, fo_p), jnp.float32).at[:fan_in, :fan_out].set(w)
            b_p = jnp.zeros((1, fo_p), jnp.float32).at[0, :fan_out].set(b)
            self.padded_params.append((w_p, b_p))

    @functools.partial(jax.jit, static_argnums=0)
    def __call__(self, x):
        B, din = x.shape
        assert din == self.shape[0], (din, self.shape[0])
        bp = _round_up(B, _SUBLANE)
        din_p = _round_up(din, _LANE)
        x_pad = jnp.zeros((bp, din_p), x.dtype).at[:B, :din].set(x)
        out_pad = _fused_mlp(x_pad, self.padded_params)
        return out_pad[:B, : self.shape[-1]]


def _reference_forward(x, params):
    # Pure-JAX reference for sanity checking (unpadded params).
    for w, b in params:
        x = x @ w + b
        x = jnp.where(x >= 0, x, _NEG_SLOPE * x)
    return x


if __name__ == "__main__":
    key = jax.random.PRNGKey(0)
    shape = (32, 64, 48, 16)  # layer widths, mirrors HiddedLayers(shape)
    batch = 8

    key, k_model, k_x = jax.random.split(key, 3)
    model = HiddedLayersPallas(shape, k_model)
    x = jax.random.normal(k_x, (batch, shape[0]), dtype=jnp.float32)

    out = jax.block_until_ready(model(x))

    ref = _reference_forward(x, model.params)
    assert out.shape == (batch, shape[-1]), out.shape
    assert jnp.allclose(out, ref, atol=1e-5, rtol=1e-5), "mismatch vs reference"

    print("KERNEL_OK")
</pallas_src>

<mosaic_0001>
module attributes {stable_mosaic.version = 11 : i64} {
  func.func @kernel(%arg0: memref<8x128xf32, #tpu.memory_space<vmem>>, %arg1: memref<128x128xf32, #tpu.memory_space<vmem>>, %arg2: memref<1x128xf32, #tpu.memory_space<vmem>>, %arg3: memref<128x128xf32, #tpu.memory_space<vmem>>, %arg4: memref<1x128xf32, #tpu.memory_space<vmem>>, %arg5: memref<128x128xf32, #tpu.memory_space<vmem>>, %arg6: memref<1x128xf32, #tpu.memory_space<vmem>>, %arg7: memref<8x128xf32, #tpu.memory_space<vmem>>) attributes {dimension_semantics = [], scalar_prefetch = 0 : i64, scratch_operands = 0 : i64, tpu.core_type = #tpu.core_type<tc>} {
    %c0 = arith.constant 0 : index
    %c0_0 = arith.constant 0 : index
    %0 = vector.load %arg0[%c0, %c0_0] : memref<8x128xf32, #tpu.memory_space<vmem>>, vector<8x128xf32>
    %c0_1 = arith.constant 0 : index
    %c0_2 = arith.constant 0 : index
    %1 = vector.load %arg1[%c0_1, %c0_2] : memref<128x128xf32, #tpu.memory_space<vmem>>, vector<128x128xf32>
    %c0_3 = arith.constant 0 : index
    %c0_4 = arith.constant 0 : index
    %2 = vector.load %arg2[%c0_3, %c0_4] : memref<1x128xf32, #tpu.memory_space<vmem>>, vector<1x128xf32>
    %cst = arith.constant dense<0.000000e+00> : vector<8x128xf32>
    %3 = tpu.matmul %0, %1, %cst {dimension_numbers = #tpu.dot_dimension_numbers<[1], [0], [0], [1], [0, 0, 1, 1], [], []>} : vector<8x128xf32>, vector<128x128xf32>, vector<8x128xf32> -> vector<8x128xf32>
    %4 = vector.broadcast %2 : vector<1x128xf32> to vector<8x128xf32>
    %5 = arith.addf %3, %4 : vector<8x128xf32>
    %cst_5 = arith.constant 0.00999999977 : f32
    %6 = vector.broadcast %cst_5 : f32 to vector<8x128xf32>
    %7 = arith.mulf %6, %5 : vector<8x128xf32>
    %8 = arith.maximumf %5, %7 : vector<8x128xf32>
    %c0_6 = arith.constant 0 : index
    %c0_7 = arith.constant 0 : index
    %9 = vector.load %arg3[%c0_6, %c0_7] : memref<128x128xf32, #tpu.memory_space<vmem>>, vector<128x128xf32>
    %c0_8 = arith.constant 0 : index
    %c0_9 = arith.constant 0 : index
    %10 = vector.load %arg4[%c0_8, %c0_9] : memref<1x128xf32, #tpu.memory_space<vmem>>, vector<1x128xf32>
    %cst_10 = arith.constant dense<0.000000e+00> : vector<8x128xf32>
    %11 = tpu.matmul %8, %9, %cst_10 {dimension_numbers = #tpu.dot_dimension_numbers<[1], [0], [0], [1], [0, 0, 1, 1], [], []>} : vector<8x128xf32>, vector<128x128xf32>, vector<8x128xf32> -> vector<8x128xf32>
    %12 = vector.broadcast %10 : vector<1x128xf32> to vector<8x128xf32>
    %13 = arith.addf %11, %12 : vector<8x128xf32>
    %cst_11 = arith.constant 0.00999999977 : f32
    %14 = vector.broadcast %cst_11 : f32 to vector<8x128xf32>
    %15 = arith.mulf %14, %13 : vector<8x128xf32>
    %16 = arith.maximumf %13, %15 : vector<8x128xf32>
    %c0_12 = arith.constant 0 : index
    %c0_13 = arith.constant 0 : index
    %17 = vector.load %arg5[%c0_12, %c0_13] : memref<128x128xf32, #tpu.memory_space<vmem>>, vector<128x128xf32>
    %c0_14 = arith.constant 0 : index
    %c0_15 = arith.constant 0 : index
    %18 = vector.load %arg6[%c0_14, %c0_15] : memref<1x128xf32, #tpu.memory_space<vmem>>, vector<1x128xf32>
    %cst_16 = arith.constant dense<0.000000e+00> : vector<8x128xf32>
    %19 = tpu.matmul %16, %17, %cst_16 {dimension_numbers = #tpu.dot_dimension_numbers<[1], [0], [0], [1], [0, 0, 1, 1], [], []>} : vector<8x128xf32>, vector<128x128xf32>, vector<8x128xf32> -> vector<8x128xf32>
    %20 = vector.broadcast %18 : vector<1x128xf32> to vector<8x128xf32>
    %21 = arith.addf %19, %20 : vector<8x128xf32>
    %cst_17 = arith.constant 0.00999999977 : f32
    %22 = vector.broadcast %cst_17 : f32 to vector<8x128xf32>
    %23 = arith.mulf %22, %21 : vector<8x128xf32>
    %24 = arith.maximumf %21, %23 : vector<8x128xf32>
    %c0_18 = arith.constant 0 : index
    %c0_19 = arith.constant 0 : index
    %25 = vector.load %arg7[%c0_18, %c0_19] : memref<8x128xf32, #tpu.memory_space<vmem>>, vector<8x128xf32>
    tpu.vector_store %arg7[%c0_18, %c0_19], %24 {strides = array<i32>} : memref<8x128xf32, #tpu.memory_space<vmem>>, vector<8x128xf32>,
    return
  }
}

</mosaic_0001>

<bundles_post_ra>
// kernel: a_call__.1
= control target key start
LH: loop header
LB: loop body
LE: loop exit
PB: predicated region body
PF: predicated region fallthrough
CT: control target
= control target key end

     0   :  { %12 = vsyncpa [#allocation3], 0  ;;  %s860_s0 = inlined_call_operand.vmem [shape: f32[8,128], index: 0, kind: input, shape index: {}]   ;;  %s861_s1 = inlined_call_operand.hbm [shape: f32[128,128], index: 1, kind: input, shape index: {}]   ;;  %s862_s2 = inlined_call_operand.vmem [shape: f32[1,128], index: 2, kind: input, shape index: {}]   ;;  %s863_s3 = inlined_call_operand.hbm [shape: f32[128,128], index: 3, kind: input, shape index: {}]   ;;  %s864_s4 = inlined_call_operand.vmem [shape: f32[1,128], index: 4, kind: input, shape index: {}]   ;;  %s865_s5 = inlined_call_operand.hbm [shape: f32[128,128], index: 5, kind: input, shape index: {}]   ;;  %s866_s6 = inlined_call_operand.vmem [shape: f32[1,128], index: 6, kind: input, shape index: {}]   ;;  %s867_s7 = inlined_call_operand.hbm [shape: f32[8,128], index: 7, kind: output, shape index: {}]  }
   0x1   :  { %13 = vsyncpa [#allocation6], 0 }
   0x2   :  { %14 = vsyncpa [#allocation4], 0  ;;  %s705_s24 = smov [#allocation5]   ;;  %s706_s26 = smov [#allocation2]  }
   0x3   :  { %s36_s25 = sshll.u32 %s705_s24, 4  ;;  %s22_s27 = sshll.u32 %s706_s26, 4  ;;  %s37_s25 = int_to_ptr.vmem [resolvable:$true] %s36_s25  ;;  %s754_s27 = int_to_ptr.vmem [resolvable:$true] %s22_s27 }
   0x4   :  { %s611_s30 = scalar_lea.hbm %s863_s3, 2048 }
   0x5   :  { %p612_p0 = scmp.ne.s32.totalorder %s863_s3, %s611_s30  ;;  %p615_p1 = scmp.lt.u32.totalorder %s611_s30, %s863_s3 }
   0x7   :  { %p617_p2 = pnand %p615_p1, %p612_p0 }
   0x9   :  { %620 = shalt.err (!%p617_p2)
}
   0xa   :  { %s621_s12 = scalar_lea.vmem %s37_s25, 2048  ;;  %p626_p4 = scmp.lt.s32.totalorder %s37_s25, %s37_s25 }
   0xb   :  { %p622_p3 = scmp.ne.s32.totalorder %s37_s25, %s621_s12  ;;  %p627_p5 = scmp.lt.s32.totalorder %s621_s12, %s621_s12 }
   0xd   :  { %p628_p6 = por %p627_p5, %p626_p4 }
   0xf   :  { %p629_p7 = pnand %p628_p6, %p622_p3 }
  0x11   :  { %632 = shalt.err (!%p629_p7)
}
  0x12   :  { %s707_s13 = smov 128   ;;  %s708_s14 = smov 8  }
  0x13   :  { %42 = dma.hbm_to_vmem [thread:$0]  %s863_s3, 2048, %s37_s25, [#allocation6], %s707_s13, %s707_s13, %s708_s14  }
  0x14   :  { %s633_s19 = scalar_lea.hbm %s861_s1, 2048 }
  0x15   :  { %p634_p8 = scmp.ne.s32.totalorder %s861_s1, %s633_s19  ;;  %p637_p9 = scmp.lt.u32.totalorder %s633_s19, %s861_s1 }
  0x17   :  { %p639_p10 = pnand %p637_p9, %p634_p8 }
  0x19   :  { %642 = shalt.err (!%p639_p10)
}
  0x1a   :  { %s643_s24 = scalar_lea.vmem %s754_s27, 2048  ;;  %p648_p12 = scmp.lt.s32.totalorder %s754_s27, %s754_s27 }
  0x1b   :  { %p644_p11 = scmp.ne.s32.totalorder %s754_s27, %s643_s24  ;;  %p649_p13 = scmp.lt.s32.totalorder %s643_s24, %s643_s24 }
  0x1d   :  { %p650_p0 = por %p649_p13, %p648_p12 }
  0x1f   :  { %p651_p1 = pnand %p650_p0, %p644_p11 }
  0x21   :  { %654 = shalt.err (!%p651_p1)
}
  0x22   :  { %28 = dma.hbm_to_vmem [thread:$0]  %s861_s1, 2048, %s754_s27, [#allocation3], %s707_s13, %s707_s13, %s708_s14  }
  0x23   :  { %s709_s26 = smov [#allocation7]   ;;  %s655_s8 = scalar_lea.hbm %s865_s5, 2048 }
  0x24   :  { %s50_s28 = sshll.u32 %s709_s26, 4  ;;  %p656_p2 = scmp.ne.s32.totalorder %s865_s5, %s655_s8  ;;  %s51_s28 = int_to_ptr.vmem [resolvable:$true] %s50_s28 }
  0x25   :  { %p659_p3 = scmp.lt.u32.totalorder %s655_s8, %s865_s5 }
  0x27   :  { %p661_p4 = pnand %p659_p3, %p656_p2 }
  0x29   :  { %664 = shalt.err (!%p661_p4)
}
  0x2a   :  { %s665_s15 = scalar_lea.vmem %s51_s28, 2048  ;;  %p670_p6 = scmp.lt.s32.totalorder %s51_s28, %s51_s28 }
  0x2b   :  { %p666_p5 = scmp.ne.s32.totalorder %s51_s28, %s665_s15  ;;  %p671_p7 = scmp.lt.s32.totalorder %s665_s15, %s665_s15 }
  0x2d   :  { %p672_p8 = por %p671_p7, %p670_p6 }
  0x2f   :  { %p673_p9 = pnand %p672_p8, %p666_p5 }
  0x31   :  { %676 = shalt.err (!%p673_p9)
}
  0x32   :  { %56 = dma.hbm_to_vmem [thread:$0]  %s865_s5, 2048, %s51_s28, [#allocation6], %s707_s13, %s707_s13, %s708_s14  }
  0x33   :  { %699 = dma.done.wait [#allocation3], 2048  }
  0x34   :  { %700 = vsyncadd [#allocation3], 4294965248 }
  0x35   :  { %701 = dma.done.wait [#allocation6], 4096  }
  0x36   :  { %702 = vsyncadd [#allocation6], 4294963200  ;;  %v710_v0 = vmov 0.0|0.0   ;;  %vm711_vm0 = vmmov 0   ;;  %v712_v1 = vmov 0.0   ;;  %v69_v2 = vld [vmem:[#allocation2] sm:$0xff] }
  0x37   :  { %530 = vmatprep.subr.bf16.mxu0 %v710_v0  ;;  %457 = vmatprep.mubr.msk.f32.mxu0 %vm711_vm0, %v712_v1  ;;  %v70_v3 = vld [vmem:[#allocation2 + $0x8] sm:$0xff]  ;;  %v71_v4 = vld [vmem:[#allocation2 + $0x10] sm:$0xff]  ;;  %v72_v6 = vld [vmem:[#allocation2 + $0x18] sm:$0xff]  ;;  %s713_s19 = smov [#allocation8]  }
  0x38   :  { %554 = vmatprep.subr.bf16.mxu1 %v710_v0  ;;  %492 = vmatprep.mubr.msk.f32.mxu1 %vm711_vm0, %v712_v1  ;;  %v531_v5 = vpack.c.bf16 %v70_v3, %v69_v2  ;;  %v534_v7 = vpack.c.bf16 %v72_v6, %v71_v4  ;;  %v73_v8 = vld [vmem:[#allocation2 + $0x20] sm:$0xff]  ;;  %v74_v9 = vld [vmem:[#allocation2 + $0x28] sm:$0xff]  ;;  %v166_v12 = vld [vmem:[#allocation5 + $0x10] sm:$0xff]  ;;  %s361_s20 = sshll.u32 %s713_s19, 4  ;;  %s362_s20 = int_to_ptr.vmem [resolvable:$true] %s361_s20 }
  0x39   :  { %v164_v10 = vld [vmem:[#allocation5] sm:$0xff]  ;;  %v165_v11 = vld [vmem:[#allocation5 + $0x8] sm:$0xff]  ;;  %v167_v13 = vld [vmem:[#allocation5 + $0x18] sm:$0xff]  ;;  %v537_v14 = vpack.c.bf16 %v74_v9, %v73_v8  ;;  %p682_p11 = scmp.lt.s32.totalorder %s362_s20, %s362_s20 }
  0x3a   :  { %532 = vmatpush3.bf16.msra.mxu0 %v531_v5  ;;  %v555_v15 = vpack.c.bf16 %v165_v11, %v164_v10  ;;  %v75_v16 = vld [vmem:[#allocation2 + $0x30] sm:$0xff]  ;;  %v76_v17 = vld [vmem:[#allocation2 + $0x38] sm:$0xff]  ;;  %v558_v18 = vpack.c.bf16 %v167_v13, %v166_v12  ;;  %v168_v19 = vld [vmem:[#allocation5 + $0x20] sm:$0xff] }
  0x3b   :  { %533 = vmatprep.subr.bf16.mxu0 %v710_v0  ;;  %v169_v20 = vld [vmem:[#allocation5 + $0x28] sm:$0xff]  ;;  %v540_v21 = vpack.c.bf16 %v76_v17, %v75_v16  ;;  %v77_v22 = vld [vmem:[#allocation2 + $0x40] sm:$0xff]  ;;  %v170_v25 = vld [vmem:[#allocation5 + $0x30] sm:$0xff] }
  0x3c   :  { %556 = vmatpush3.bf16.msra.mxu1 %v555_v15  ;;  %v78_v23 = vld [vmem:[#allocation2 + $0x48] sm:$0xff]  ;;  %v561_v24 = vpack.c.bf16 %v169_v20, %v168_v19  ;;  %v171_v26 = vld [vmem:[#allocation5 + $0x38] sm:$0xff]  ;;  %v79_v28 = vld [vmem:[#allocation2 + $0x50] sm:$0xff] }
  0x3d   :  { %557 = vmatprep.subr.bf16.mxu1 %v710_v0  ;;  %v543_v27 = vpack.c.bf16 %v78_v23, %v77_v22  ;;  %v80_v29 = vld [vmem:[#allocation2 + $0x58] sm:$0xff]  ;;  %v564_v30 = vpack.c.bf16 %v171_v26, %v170_v25  ;;  %v172_v31 = vld [vmem:[#allocation5 + $0x40] sm:$0xff]  ;;  %v173_v32 = vld [vmem:[#allocation5 + $0x48] sm:$0xff] }
  0x3e   :  { %535 = vmatpush3.bf16.msra.mxu0 %v534_v7  ;;  %v546_v33 = vpack.c.bf16 %v80_v29, %v79_v28  ;;  %v81_v34 = vld [vmem:[#allocation2 + $0x60] sm:$0xff]  ;;  %v82_v35 = vld [vmem:[#allocation2 + $0x68] sm:$0xff]  ;;  %v567_v36 = vpack.c.bf16 %v173_v32, %v172_v31  ;;  %v174_v37 = vld [vmem:[#allocation5 + $0x50] sm:$0xff] }
  0x3f   :  { %536 = vmatprep.subr.bf16.mxu0 %v710_v0  ;;  %v175_v38 = vld [vmem:[#allocation5 + $0x58] sm:$0xff]  ;;  %v549_v39 = vpack.c.bf16 %v82_v35, %v81_v34  ;;  %v83_v40 = vld [vmem:[#allocation2 + $0x70] sm:$0xff]  ;;  %v68_v44 = vld [vmem:[%s860_s0] sm:$0xff] }
  0x40   :  { %559 = vmatpush3.bf16.msra.mxu1 %v558_v18  ;;  %v84_v41 = vld [vmem:[#allocation2 + $0x78] sm:$0xff]  ;;  %v570_v42 = vpack.c.bf16 %v175_v38, %v174_v37  ;;  %v176_v45 = vld [vmem:[#allocation5 + $0x60] sm:$0xff]  ;;  %v177_v46 = vld [vmem:[#allocation5 + $0x68] sm:$0xff] }
  0x41   :  { %560 = vmatprep.subr.bf16.mxu1 %v710_v0  ;;  %v552_v43 = vpack.c.bf16 %v84_v41, %v83_v40  ;;  %v573_v47 = vpack.c.bf16 %v177_v46, %v176_v45  ;;  %v178_v48 = vld [vmem:[#allocation5 + $0x70] sm:$0xff]  ;;  %v179_v49 = vld [vmem:[#allocation5 + $0x78] sm:$0xff]  ;;  %v259_v51 = vld [vmem:[#allocation7] sm:$0xff] }
  0x42   :  { %538 = vmatpush3.bf16.msra.mxu0 %v537_v14  ;;  %v576_v50 = vpack.c.bf16 %v179_v49, %v178_v48  ;;  %v260_v52 = vld [vmem:[#allocation7 + $0x8] sm:$0xff]  ;;  %v261_v53 = vld [vmem:[#allocation7 + $0x10] sm:$0xff]  ;;  %v262_v55 = vld [vmem:[#allocation7 + $0x18] sm:$0xff] }
  0x43   :  { %539 = vmatprep.subr.bf16.mxu0 %v710_v0  ;;  %v579_v54 = vpack.c.bf16 %v260_v52, %v259_v51  ;;  %v582_v56 = vpack.c.bf16 %v262_v55, %v261_v53  ;;  %v263_v57 = vld [vmem:[#allocation7 + $0x20] sm:$0xff]  ;;  %v264_v58 = vld [vmem:[#allocation7 + $0x28] sm:$0xff]  ;;  %v265_v60 = vld [vmem:[#allocation7 + $0x30] sm:$0xff] }
  0x44   :  { %562 = vmatpush3.bf16.msra.mxu1 %v561_v24  ;;  %v585_v59 = vpack.c.bf16 %v264_v58, %v263_v57  ;;  %v266_v61 = vld [vmem:[#allocation7 + $0x38] sm:$0xff]  ;;  %v267_v63 = vld [vmem:[#allocation7 + $0x40] sm:$0xff]  ;;  %v269_v3 = vld [vmem:[#allocation7 + $0x50] sm:$0xff] }
  0x45   :  { %563 = vmatprep.subr.bf16.mxu1 %v710_v0  ;;  %v588_v62 = vpack.c.bf16 %v266_v61, %v265_v60  ;;  %v270_v4 = vld [vmem:[#allocation7 + $0x58] sm:$0xff]  ;;  %v371_v6 = vld [vmem:[%s862_s2] ss:$0 sm:$0xff]  ;;  %v272_v13 = vld [vmem:[#allocation7 + $0x68] sm:$0xff] }
  0x46   :  { %541 = vmatpush3.bf16.msra.mxu0 %v540_v21  ;;  %v594_v5 = vpack.c.bf16 %v270_v4, %v269_v3  ;;  %v271_v12 = vld [vmem:[#allocation7 + $0x60] sm:$0xff]  ;;  %v273_v15 = vld [vmem:[#allocation7 + $0x70] sm:$0xff]  ;;  %v274_v16 = vld [vmem:[#allocation7 + $0x78] sm:$0xff] }
  0x47   :  { %542 = vmatprep.subr.bf16.mxu0 %v710_v0  ;;  %v597_v14 = vpack.c.bf16 %v272_v13, %v271_v12  ;;  %v600_v17 = vpack.c.bf16 %v274_v16, %v273_v15  ;;  %v372_v18 = vld [vmem:[%s864_s4] ss:$0 sm:$0xff]  ;;  %s677_s4 = scalar_lea.vmem %s362_s20, 128 }
  0x48   :  { %565 = vmatpush3.bf16.msra.mxu1 %v564_v30  ;;  %v373_v24 = vld [vmem:[%s866_s6] ss:$0 sm:$0xff]  ;;  %p678_p10 = scmp.ne.s32.totalorder %s362_s20, %s677_s4  ;;  %p683_p12 = scmp.lt.s32.totalorder %s677_s4, %s677_s4 }
  0x49   :  { %566 = vmatprep.subr.bf16.mxu1 %v710_v0 }
  0x4a   :  { %544 = vmatpush3.bf16.msra.mxu0 %v543_v27  ;;  %p684_p13 = por %p683_p12, %p682_p11 }
  0x4b   :  { %545 = vmatprep.subr.bf16.mxu0 %v710_v0 }
  0x4c   :  { %568 = vmatpush3.bf16.msra.mxu1 %v567_v36  ;;  %p685_p0 = pnand %p684_p13, %p678_p10 }
  0x4d   :  { %569 = vmatprep.subr.bf16.mxu1 %v710_v0 }
  0x4e   :  { %547 = vmatpush3.bf16.msra.mxu0 %v546_v33 }
  0x4f   :  { %548 = vmatprep.subr.bf16.mxu0 %v710_v0 }
  0x50   :  { %571 = vmatpush3.bf16.msra.mxu1 %v570_v42 }
  0x51   :  { %572 = vmatprep.subr.bf16.mxu1 %v710_v0 }
  0x52   :  { %550 = vmatpush3.bf16.msra.mxu0 %v549_v39 }
  0x53   :  { %551 = vmatprep.subr.bf16.mxu0 %v710_v0 }
  0x54   :  { %574 = vmatpush3.bf16.msra.mxu1 %v573_v47 }
  0x55   :  { %575 = vmatprep.subr.bf16.mxu1 %v710_v0 }
  0x56   :  { %553 = vmatpush3.bf16.msra.mxu0 %v552_v43 }
  0x57   :  { %578 = vmatprep.subr.bf16.mxu0 %v710_v0 }
  0x58   :  { %577 = vmatpush3.bf16.msra.mxu1 %v576_v50 }
  0x59   :  { %458 = vmatmul.mubr.f32.vlgmr.msra.gmra.mrb[0].mxu0 %v68_v44 }
  0x5a   :  { %527 = vmatprep.mubr.msk.f32.mxu0 %vm711_vm0, %v712_v1  ;;  %580 = vmatpush3.bf16.msra.mxu0 %v579_v54  ;;  %v268_v1 = vld [vmem:[#allocation7 + $0x48] sm:$0xff] }
  0x5b   :  { %581 = vmatprep.subr.bf16.mxu0 %v710_v0  ;;  %v591_v2 = vpack.c.bf16 %v268_v1, %v267_v63 }
  0x5e   :  { %583 = vmatpush3.bf16.msra.mxu0 %v582_v56 }
  0x5f   :  { %584 = vmatprep.subr.bf16.mxu0 %v710_v0 }
  0x62   :  { %586 = vmatpush3.bf16.msra.mxu0 %v585_v59 }
  0x63   :  { %587 = vmatprep.subr.bf16.mxu0 %v710_v0 }
  0x66   :  { %589 = vmatpush3.bf16.msra.mxu0 %v588_v62 }
  0x67   :  { %590 = vmatprep.subr.bf16.mxu0 %v710_v0 }
  0x6a   :  { %592 = vmatpush3.bf16.msra.mxu0 %v591_v2 }
  0x6b   :  { %593 = vmatprep.subr.bf16.mxu0 %v710_v0 }
  0x6e   :  { %595 = vmatpush3.bf16.msra.mxu0 %v594_v5 }
  0x6f   :  { %596 = vmatprep.subr.bf16.mxu0 %v710_v0 }
  0x72   :  { %598 = vmatpush3.bf16.msra.mxu0 %v597_v14 }
  0x73   :  { %599 = vmatprep.subr.bf16.mxu0 %v710_v0 }
  0x76   :  { %601 = vmatpush3.bf16.msra.mxu0 %v600_v17 }
 0x12c   :  { %v158_v7 = vpop.f32.mrb[0].mxu0 }
 0x12d   :  { %v159_v8 = vadd.f32 %v371_v6, %v158_v7  ;;  %v459_v9 = vpop.f32.mrb[1].mxu0 }
 0x12f   :  { %v162_v10 = vmul.f32 0.01, %v159_v8 }
 0x131   :  { %v163_v11 = vmax.f32 %v159_v8, %v162_v10 }
 0x133   :  { %493 = vmatmul.mubr.f32.vlgmr.msra.gmra.mrb[0].mxu1 %v163_v11 }
 0x206   :  { %v253_v19 = vpop.f32.mrb[0].mxu1 }
 0x207   :  { %v254_v20 = vadd.f32 %v372_v18, %v253_v19  ;;  %v494_v21 = vpop.f32.mrb[1].mxu1 }
 0x209   :  { %v257_v22 = vmul.f32 0.01, %v254_v20 }
 0x20b   :  { %v258_v23 = vmax.f32 %v254_v20, %v257_v22 }
 0x20d   :  { %528 = vmatmul.mubr.f32.vlgmr.msra.gmra.mrb[2].mxu0 %v258_v23 }
 0x2e0   :  { %v348_v25 = vpop.f32.mrb[2].mxu0 }
 0x2e1   :  { %v349_v0 = vadd.f32 %v373_v24, %v348_v25  ;;  %v529_v26 = vpop.f32.mrb[3].mxu0 }
 0x2e3   :  { %v352_v27 = vmul.f32 0.01, %v349_v0 }
 0x2e5   :  { %v353_v28 = vmax.f32 %v349_v0, %v352_v27 }
 0x2e7   :  { %354 = vst [vmem:[#allocation8] sm:$0xff] %v353_v28 }
 0x2e8   :  { %688 = shalt.err (!%p685_p0)
}
 0x2e9   :  { %s689_s6 = scalar_lea.hbm %s867_s7, 128 }
 0x2ea   :  { %p690_p1 = scmp.ne.s32.totalorder %s867_s7, %s689_s6  ;;  %p693_p2 = scmp.lt.u32.totalorder %s689_s6, %s867_s7 }
 0x2ec   :  { %p695_p3 = pnand %p693_p2, %p690_p1 }
 0x2ee   :  { %698 = shalt.err (!%p695_p3)
}
 0x2ef   :  { %364 = dma.vmem_to_hbm [thread:$0]  %s362_s20, 128, %s867_s7, [#allocation4]  }
 0x2f0   :  { %703 = dma.done.wait [#allocation4], 128  }
 0x2f1   :  { %704 = vsyncadd [#allocation4], 4294967168 }
 0x2f2   :  { %368 = vsyncpa [#allocation3], 1 }
 0x2f3   :  { %369 = vsyncpa [#allocation6], 1 }
 0x2f4   :  { %370 = vsyncpa [#allocation4], 1 }

</bundles_post_ra>
